<compile_context>
chip_gen: v5e
topology: v5e:2x2
jax: 0.10.0
libtpu: 0.0.40
codegen_flags: <defaults>
</compile_context>

<pallas_src>
import functools

import numpy as np

import jax
import jax.numpy as jnp
from jax import lax
from jax.experimental import pallas as pl
from jax.experimental.pallas import tpu as pltpu


def masked_conv2d_kernel(x_ref, w_ref, b_ref, o_ref, col_ref, *,
                         stride, h_out, w_out, taps):
    """One batch element per grid step.

    x_ref:   (1, Hp, Wp, Cin)       padded NHWC input
    w_ref:   (T*Cin, Cout)          pre-masked weights, rows ordered (tap, ci)
    b_ref:   (1, Cout)              bias
    o_ref:   (1, Cout, Hout*Wout)   lane-dense output (spatial dim last)
    col_ref: (Hout*Wout, T*Cin)     VMEM scratch for the im2col slab
    """
    x = x_ref[0]                                   # (Hp, Wp, Cin)
    cin = x.shape[-1]
    hw = h_out * w_out

    # im2col: one shifted (strided) patch per active tap, written side by side
    # into scratch.  Each write is a small static lane-slice store; the slab is
    # then consumed by a single MXU matmul with contraction depth K = T*Cin.
    for t, (kh, kw) in enumerate(taps):
        patch = lax.slice(
            x,
            (kh, kw, 0),
            (kh + (h_out - 1) * stride + 1,
             kw + (w_out - 1) * stride + 1,
             cin),
            (stride, stride, 1),
        )                                          # (h_out, w_out, cin)
        col_ref[:, t * cin:(t + 1) * cin] = patch.reshape(hw, cin)

    # Single fused matmul (HW, T*Cin) @ (T*Cin, Cout), f32 accumulation.
    acc = jnp.dot(col_ref[...], w_ref[...], preferred_element_type=jnp.float32)
    acc = acc + b_ref[...]                         # broadcast (1, Cout)

    # One small XLU transpose so the stored block is (Cout, Hout*Wout): the
    # last dim is a multiple of 128 -> unmasked lane-dense stores instead of
    # Cout(=8)-of-128-lane masked partial stores.
    o_ref[0] = acc.T.astype(o_ref.dtype)


def _active_taps(mask_oihw):
    """Static tuple of (kh, kw) taps whose mask slice is not all-zero.

    Dropping all-zero taps never changes semantics (weights are pre-multiplied
    by the mask, so those taps contribute exactly zero).  If the mask is a
    tracer we cannot inspect it, so keep all 9 taps.
    """
    all_nine = tuple((kh, kw) for kh in range(3) for kw in range(3))
    if isinstance(mask_oihw, jax.core.Tracer):
        return all_nine
    m = np.asarray(jax.device_get(mask_oihw))
    taps = tuple((kh, kw) for (kh, kw) in all_nine
                 if np.any(m[:, :, kh, kw] != 0))
    return taps if taps else ((0, 0),)   # degenerate all-zero mask


def masked_conv2d(x_nchw, weight_oihw, mask_oihw, bias, *, stride, padding):
    """Forward pass of MaskedConv2d. Inputs/outputs are NCHW like PyTorch."""
    n, cin, h, w = x_nchw.shape
    cout = weight_oihw.shape[0]
    h_out = (h + 2 * padding - 3) // stride + 1
    w_out = (w + 2 * padding - 3) // stride + 1

    taps = _active_taps(mask_oihw)
    n_taps = len(taps)

    # Glue (runs once in XLA, outside the kernel):
    #  * mask folded into the weights,
    #  * only active taps kept -> (T*Cin, Cout) matmul operand, row order
    #    (tap, ci),
    #  * input transposed to NHWC + spatially padded.  NHWC is kept for the
    #    input so the in-kernel im2col only needs the cheap leading-dim-merging
    #    reshape (Hout, Wout, Cin) -> (Hout*Wout, Cin).
    x = jnp.transpose(x_nchw, (0, 2, 3, 1))                       # NHWC
    x = jnp.pad(x, ((0, 0), (padding, padding), (padding, padding), (0, 0)))
    hp, wp = x.shape[1], x.shape[2]

    wm = weight_oihw * mask_oihw                                  # pre-masked
    w_taps = jnp.stack([wm[:, :, kh, kw] for (kh, kw) in taps], axis=0)
    w_mat = jnp.transpose(w_taps, (0, 2, 1)).reshape(n_taps * cin, cout)
    b2 = bias.reshape(1, cout)

    kernel = functools.partial(
        masked_conv2d_kernel, stride=stride, h_out=h_out, w_out=w_out,
        taps=taps)

    out_flat = pl.pallas_call(
        kernel,
        out_shape=jax.ShapeDtypeStruct((n, cout, h_out * w_out), x.dtype),
        grid=(n,),
        in_specs=[
            pl.BlockSpec((1, hp, wp, cin), lambda i: (i, 0, 0, 0)),
            pl.BlockSpec((n_taps * cin, cout), lambda i: (0, 0)),
            pl.BlockSpec((1, cout), lambda i: (0, 0)),
        ],
        out_specs=pl.BlockSpec((1, cout, h_out * w_out), lambda i: (i, 0, 0)),
        scratch_shapes=[pltpu.VMEM((h_out * w_out, n_taps * cin), x.dtype)],
        compiler_params=pltpu.CompilerParams(
            dimension_semantics=("parallel",),
            vmem_limit_bytes=32 * 1024 * 1024),
    )(x, w_mat, b2)

    # (N, Cout, Hout*Wout) -> NCHW is a free contiguous reshape (no transpose).
    return out_flat.reshape(n, cout, h_out, w_out)


def make_mask(out_channels, in_channels):
    # Reproduce the PyTorch mask construction exactly:
    #   mask[:, :, 2, 2] = 0 ; mask[:, :, 1, 1:] = 0 ; mask[:, :, 2] = 0
    m = jnp.ones((out_channels, in_channels, 3, 3), jnp.float32)
    m = m.at[:, :, 2, 2].set(0.0)
    m = m.at[:, :, 1, 1:].set(0.0)
    m = m.at[:, :, 2].set(0.0)
    return m


if __name__ == "__main__":
    # Small deterministic setup: MaskedConv2d(in_channels=4, out_channels=8,
    # stride=1, padding=1) applied to x of shape [2, 4, 16, 16] (NCHW).
    key = jax.random.PRNGKey(0)
    k_x, k_w, k_b = jax.random.split(key, 3)

    N, Cin, H, W = 2, 4, 16, 16
    Cout, stride, padding = 8, 1, 1

    x = jax.random.normal(k_x, (N, Cin, H, W), jnp.float32)

    # nn.Conv2d default init: uniform(-1/sqrt(fan_in), 1/sqrt(fan_in))
    fan_in = Cin * 3 * 3
    bound = 1.0 / (fan_in ** 0.5)
    weight = jax.random.uniform(k_w, (Cout, Cin, 3, 3), jnp.float32,
                                minval=-bound, maxval=bound)
    bias = jax.random.uniform(k_b, (Cout,), jnp.float32,
                              minval=-bound, maxval=bound)
    mask = make_mask(Cout, Cin)

    out = masked_conv2d(x, weight, mask, bias, stride=stride, padding=padding)
    out = jax.block_until_ready(out)

    # Cross-check against XLA's conv to validate semantics.
    ref = lax.conv_general_dilated(
        x, weight * mask,
        window_strides=(stride, stride),
        padding=((padding, padding), (padding, padding)),
        dimension_numbers=("NCHW", "OIHW", "NCHW"),
    ) + bias[None, :, None, None]

    assert out.shape == (N, Cout, H, W), out.shape
    assert jnp.allclose(out, ref, atol=1e-5, rtol=1e-5), (
        float(jnp.max(jnp.abs(out - ref))))

    print("KERNEL_OK")
</pallas_src>

<mosaic_0001>
module attributes {stable_mosaic.version = 11 : i64} {
  func.func @masked_conv2d_kernel(%arg0: i32, %arg1: memref<1x18x18x4xf32, #tpu.memory_space<vmem>>, %arg2: memref<16x8xf32, #tpu.memory_space<vmem>>, %arg3: memref<1x8xf32, #tpu.memory_space<vmem>>, %arg4: memref<1x8x256xf32, #tpu.memory_space<vmem>>, %arg5: memref<256x16xf32, #tpu.memory_space<vmem>>) attributes {dimension_semantics = [#tpu.dimension_semantics<parallel>], iteration_bounds = array<i64: 2>, scalar_prefetch = 0 : i64, scratch_operands = 1 : i64, tpu.core_type = #tpu.core_type<tc>, window_params = [{transform_indices = @transform_0, window_bounds = array<i64: 1, 18, 18, 4>}, {pipeline_mode = #tpu.pipeline_mode<synchronous>, transform_indices = @transform_1, window_bounds = array<i64: 16, 8>}, {pipeline_mode = #tpu.pipeline_mode<synchronous>, transform_indices = @transform_2, window_bounds = array<i64: 1, 8>}, {transform_indices = @transform_3, window_bounds = array<i64: 1, 8, 256>}]} {
    %c0 = arith.constant 0 : index
    %c0_0 = arith.constant 0 : index
    %c0_1 = arith.constant 0 : index
    %c0_2 = arith.constant 0 : index
    %0 = vector.load %arg1[%c0, %c0_0, %c0_1, %c0_2] : memref<1x18x18x4xf32, #tpu.memory_space<vmem>>, vector<1x18x18x4xf32>
    %1 = vector.shape_cast %0 : vector<1x18x18x4xf32> to vector<18x18x4xf32>
    %2 = vector.extract_strided_slice %1 {offsets = [0, 0, 0], sizes = [16, 16, 4], strides = [1, 1, 1]} : vector<18x18x4xf32> to vector<16x16x4xf32>
    %3 = vector.shape_cast %2 : vector<16x16x4xf32> to vector<256x4xf32>
    %c0_3 = arith.constant 0 : index
    %c0_4 = arith.constant 0 : index
    %4 = vector.load %arg5[%c0_3, %c0_4] : memref<256x16xf32, #tpu.memory_space<vmem>>, vector<256x4xf32>
    tpu.vector_store %arg5[%c0_3, %c0_4], %3 {strides = array<i32>} : memref<256x16xf32, #tpu.memory_space<vmem>>, vector<256x4xf32>,
    %5 = vector.extract_strided_slice %1 {offsets = [0, 1, 0], sizes = [16, 16, 4], strides = [1, 1, 1]} : vector<18x18x4xf32> to vector<16x16x4xf32>
    %6 = vector.shape_cast %5 : vector<16x16x4xf32> to vector<256x4xf32>
    %c0_5 = arith.constant 0 : index
    %c4 = arith.constant 4 : index
    %7 = vector.load %arg5[%c0_5, %c4] : memref<256x16xf32, #tpu.memory_space<vmem>>, vector<256x4xf32>
    tpu.vector_store %arg5[%c0_5, %c4], %6 {strides = array<i32>} : memref<256x16xf32, #tpu.memory_space<vmem>>, vector<256x4xf32>,
    %8 = vector.extract_strided_slice %1 {offsets = [0, 2, 0], sizes = [16, 16, 4], strides = [1, 1, 1]} : vector<18x18x4xf32> to vector<16x16x4xf32>
    %9 = vector.shape_cast %8 : vector<16x16x4xf32> to vector<256x4xf32>
    %c0_6 = arith.constant 0 : index
    %c8 = arith.constant 8 : index
    %10 = vector.load %arg5[%c0_6, %c8] : memref<256x16xf32, #tpu.memory_space<vmem>>, vector<256x4xf32>
    tpu.vector_store %arg5[%c0_6, %c8], %9 {strides = array<i32>} : memref<256x16xf32, #tpu.memory_space<vmem>>, vector<256x4xf32>,
    %11 = vector.extract_strided_slice %1 {offsets = [1, 0, 0], sizes = [16, 16, 4], strides = [1, 1, 1]} : vector<18x18x4xf32> to vector<16x16x4xf32>
    %12 = vector.shape_cast %11 : vector<16x16x4xf32> to vector<256x4xf32>
    %c0_7 = arith.constant 0 : index
    %c12 = arith.constant 12 : index
    %13 = vector.load %arg5[%c0_7, %c12] : memref<256x16xf32, #tpu.memory_space<vmem>>, vector<256x4xf32>
    tpu.vector_store %arg5[%c0_7, %c12], %12 {strides = array<i32>} : memref<256x16xf32, #tpu.memory_space<vmem>>, vector<256x4xf32>,
    %c0_8 = arith.constant 0 : index
    %c0_9 = arith.constant 0 : index
    %14 = vector.load %arg5[%c0_8, %c0_9] : memref<256x16xf32, #tpu.memory_space<vmem>>, vector<256x16xf32>
    %c0_10 = arith.constant 0 : index
    %c0_11 = arith.constant 0 : index
    %15 = vector.load %arg2[%c0_10, %c0_11] : memref<16x8xf32, #tpu.memory_space<vmem>>, vector<16x8xf32>
    %cst = arith.constant dense<0.000000e+00> : vector<256x8xf32>
    %16 = tpu.matmul %14, %15, %cst {dimension_numbers = #tpu.dot_dimension_numbers<[1], [0], [0], [1], [0, 0, 1, 1], [], []>} : vector<256x16xf32>, vector<16x8xf32>, vector<256x8xf32> -> vector<256x8xf32>
    %c0_12 = arith.constant 0 : index
    %c0_13 = arith.constant 0 : index
    %17 = vector.load %arg3[%c0_12, %c0_13] : memref<1x8xf32, #tpu.memory_space<vmem>>, vector<1x8xf32>
    %18 = vector.broadcast %17 : vector<1x8xf32> to vector<256x8xf32>
    %19 = arith.addf %16, %18 : vector<256x8xf32>
    %20 = tpu.transpose %19, [1, 0] : vector<256x8xf32> -> vector<8x256xf32>
    %c0_14 = arith.constant 0 : index
    %c0_15 = arith.constant 0 : index
    %c0_16 = arith.constant 0 : index
    %21 = vector.load %arg4[%c0_14, %c0_15, %c0_16] : memref<1x8x256xf32, #tpu.memory_space<vmem>>, vector<1x8x256xf32>
    %22 = vector.shape_cast %21 : vector<1x8x256xf32> to vector<8x256xf32>
    %23 = vector.shape_cast %20 : vector<8x256xf32> to vector<1x8x256xf32>
    tpu.vector_store %arg4[%c0_14, %c0_15, %c0_16], %23 {strides = array<i32>} : memref<1x8x256xf32, #tpu.memory_space<vmem>>, vector<1x8x256xf32>,
    return
  }
  func.func @transform_0(%arg0: i32) -> (i32, i32, i32, i32) {
    %c0_i32 = arith.constant 0 : i32
    %c0_i32_0 = arith.constant 0 : i32
    %c0_i32_1 = arith.constant 0 : i32
    %c0_i32_2 = arith.constant 0 : i32
    return %arg0, %c0_i32, %c0_i32_0, %c0_i32_1 : i32, i32, i32, i32
  }
  func.func @transform_1(%arg0: i32) -> (i32, i32) {
    %c0_i32 = arith.constant 0 : i32
    %c0_i32_0 = arith.constant 0 : i32
    %c0_i32_1 = arith.constant 0 : i32
    return %c0_i32, %c0_i32_0 : i32, i32
  }
  func.func @transform_2(%arg0: i32) -> (i32, i32) {
    %c0_i32 = arith.constant 0 : i32
    %c0_i32_0 = arith.constant 0 : i32
    %c0_i32_1 = arith.constant 0 : i32
    return %c0_i32, %c0_i32_0 : i32, i32
  }
  func.func @transform_3(%arg0: i32) -> (i32, i32, i32) {
    %c0_i32 = arith.constant 0 : i32
    %c0_i32_0 = arith.constant 0 : i32
    %c0_i32_1 = arith.constant 0 : i32
    return %arg0, %c0_i32, %c0_i32_0 : i32, i32, i32
  }
}

</mosaic_0001>

<bundles_post_ra>
// kernel: tpu_custom_call.1
= control target key start
LH: loop header
LB: loop body
LE: loop exit
PB: predicated region body
PF: predicated region fallthrough
CT: control target
= control target key end

     0   :  { %8 = vsyncpa [#allocation4], 0  ;;  %s2184_s0 = inlined_call_operand.vmem [shape: f32[2,18,18,4], index: 0, kind: input, shape index: {}]   ;;  %s2185_s1 = inlined_call_operand.vmem [shape: f32[16,8], index: 1, kind: input, shape index: {}]   ;;  %s2186_s2 = inlined_call_operand.vmem [shape: f32[1,8], index: 2, kind: input, shape index: {}]   ;;  %s2187_s3 = inlined_call_operand.hbm [shape: f32[2,8,256], index: 3, kind: output, shape index: {}]  }
   0x1   :  { %10 = vsyncpa [#allocation4 + $0x1], 0  ;;  %s1422_s12 = smov 0   ;;  %s1424_s13 = smov 0  }
   0x2   :  { %s1426_s14 = smov 0   ;;  %s1428_s15 = smov 0  }
   0x3 LB: > { %s1443_s16 = sadd.s32 4294967295, %s1397_s15   ;;  %s1241_s17 = sadd.s32 4294967294, %s1397_s15   ;;  %s1397_s15 = sphi %s1428_s15, %s2193_s15   ;;  %s1393_s14 = sphi %s1426_s14, %s2192_s14   ;;  %s1389_s13 = sphi %s1424_s13, %s2191_s13   ;;  %s1385_s12 = sphi %s1422_s12, %s2190_s12  }
   0x4   : > { %s1447_s18 = sadd.s32 1, %s1397_s15   ;;  %s91_s19 = sadd.s32 1, %s1393_s14 }
   0x5   : > { %s88_s20 = ssub.s32 %s1397_s15, %s1447_s18  ;;  %p101_p0 = scmp.ne.s32.totalorder %s1393_s14, %s1389_s13 }
   0x6   : > { %p89_p1 = scmp.eq.s32.totalorder %s88_s20, 0  ;;  %p102_p2 = scmp.eq.s32.totalorder %s1443_s16, 1 }
   0x7   : > { %p107_p3 = scmp.ne.s32.totalorder %s1389_s13, %s1385_s12  ;;  %p108_p4 = scmp.eq.s32.totalorder %s1241_s17, 1 }
   0x8   : > { %s1458_s21 = scalar_select %p89_p1, %s1393_s14, %s91_s19  }
   0x9   : > { %p1460_p5 = por %p102_p2, %p101_p0  ;;  %p1464_p6 = por %p108_p4, %p107_p3 }
   0xa   : > { %p1244_p7 = scmp.ge.s32.totalorder %s1397_s15, 1  ;;  %p140_p8 = scmp.lt.s32.totalorder %s1397_s15, 3 }
   0xc   : > { %p141_p9 = pnand %p1244_p7, %p140_p8 }
   0xd   : > { %p164_p10 = scmp.lt.s32.totalorder (!%p141_p9), %s1443_s16, 1  ;;  %s1399_s29 = smov (!%p141_p9), 4  }
   0xe   : > { %144 = sbr.rel (%p141_p9) target bundleno = 607 (0x25f), region = 32  ;;  %s1400_s30 = smov (!%p141_p9), 8  }
   0xf   : > { %s1401_s4 = smov (!%p141_p9), 12   ;;  %s161_s11 = sand.u32 (!%p141_p9), 1, %s1389_s13  }
  0x10   : > { %s1245_s17 = sshll.u32 (!%p141_p9), %s161_s11, 4  ;;  %s1284_s19 = sshll.u32 (!%p141_p9), %s1443_s16, 4 }
  0x11   : > { %s163_s26 = scalar_lea.vmem (!%p141_p9), [#allocation3], %s1245_s17  ;;  %s1355_s6 = scalar_lea.hbm (!%p141_p9), %s2187_s3, 32 }
  0x12   : > { %s1179_s27 = sshll.u32 (!%p141_p9), %s163_s26, 4  ;;  %s1180_s27 = int_to_ptr.vmem [resolvable:$true] %s1179_s27 }
  0x13   : > { %s165_s24 = scalar_select %p164_p10, %s1443_s16, 1  ;;  %vm300_vm0 = vcmask 1046528   ;;  %vm510_vm1 = vcmask 1045504   ;;  %vm219_vm2 = vcmask 31744   ;;  %vm477_vm3 = vcmask 64544  }
  0x14   : > { %vm687_vm4 = vcmask 97344   ;;  %vm818_vm5 = vcmask 130144   ;;  %vm889_vm6 = vcmask 130048  }
  0x15   : > { %s1291_s25 = smul.u32 432, %s165_s24 }
  0x17   : > { %s1475_s28 = scalar_lea.vmem %s2184_s0, %s1291_s25  ;;  %s1177_s25 = scalar_lea.hbm %s2187_s3, %s1284_s19 }
  0x18   : > { %v1478_v0 = vld [vmem:[%s1475_s28 + $0x18] sm:$0xff]  ;;  %v1481_v1 = vld [vmem:[%s1475_s28 + $0x20] sm:$0xff]  ;;  %v1489_v5 = vld [vmem:[%s1475_s28 + $0x8] sm:$0xff] }
  0x19   : > { %v1484_v2 = vld [vmem:[%s1475_s28] sm:$0xff]  ;;  %v306_v3 = vrot.slane %v1478_v0, 1  ;;  %v307_v4 = vrot.slane %v1481_v1, 1  ;;  %v302_v7 = vrot.slane %v1489_v5, 1  ;;  %v1494_v8 = vld [vmem:[%s1475_s28 + $0x28] sm:$0x3] }
  0x1a   : > { %v301_v6 = vrot.slane %v1484_v2, 1  ;;  %v1498_v10 = vld [vmem:[%s1475_s28 + $0x10] sm:$0x3]  ;;  %v309_v12 = vrot.slane %v1494_v8, 1  ;;  %v1508_v14 = vld [vmem:[%s1475_s28 + $0x38] sm:$0xff]  ;;  %v1528_v25 = vld [vmem:[%s1475_s28 + $0x48] sm:$0xff] }
  0x1b   : > { %v308_v9 = vsel %vm300_vm0, %v306_v3, %v307_v4  ;;  %v1505_v13 = vld [vmem:[%s1475_s28 + $0x30] sm:$0xff]  ;;  %v304_v15 = vrot.slane %v1498_v10, 1  ;;  %v312_v17 = vrot.slane %v1508_v14, 1  ;;  %v1514_v18 = vld [vmem:[%s1475_s28 + $0x40] sm:$0x3]  ;;  %v316_v28 = vrot.slane %v1528_v25, 1 }
  0x1c   : > { %385 = vrot.lane.b32.xlu1 %v308_v9, %s1399_s29  ;;  %v303_v11 = vsel %vm300_vm0, %v301_v6, %v302_v7  ;;  %v311_v16 = vrot.slane %v1505_v13, 1  ;;  %v310_v20 = vsel %vm300_vm0, %v307_v4, %v309_v12  ;;  %v1521_v22 = vld [vmem:[%s1475_s28 + $0x50] sm:$0xff]  ;;  %v1524_v23 = vld [vmem:[%s1475_s28 + $0x58] sm:$0x3]  ;;  %v314_v24 = vrot.slane %v1514_v18, 1  ;;  %v1537_v30 = vld [vmem:[%s1475_s28 + $0x60] sm:$0xff] }
  0x1d   : > { %381 = vrot.lane.b32.xlu0 %v303_v11, %s1399_s29  ;;  %v305_v21 = vsel %vm300_vm0, %v302_v7, %v304_v15  ;;  %v317_v26 = vrot.slane %v1521_v22, 1  ;;  %v319_v27 = vrot.slane %v1524_v23, 1  ;;  %v1541_v32 = vld [vmem:[%s1475_s28 + $0x68] sm:$0xff]  ;;  %v1546_v34 = vld [vmem:[%s1475_s28 + $0x78] sm:$0xff]  ;;  %v1549_v35 = vld [vmem:[%s1475_s28 + $0x80] sm:$0xff]  ;;  %v321_v36 = vrot.slane %v1537_v30, 1 }
  0x1e   : > { %v313_v19 = vsel %vm300_vm0, %v311_v16, %v312_v17  ;;  %v315_v29 = vsel %vm300_vm0, %v312_v17, %v314_v24  ;;  %v1553_v37 = vld [vmem:[%s1475_s28 + $0x70] sm:$0x3]  ;;  %v322_v38 = vrot.slane %v1541_v32, 1  ;;  %v326_v39 = vrot.slane %v1546_v34, 1  ;;  %v1563_v43 = vld [vmem:[%s1475_s28 + $0x88] sm:$0x3] }
  0x1f   : > { %389 = vrot.lane.b32.xlu2 %v313_v19, %s1399_s29  ;;  %v320_v31 = vsel %vm300_vm0, %v317_v26, %v319_v27  ;;  %v318_v33 = vsel %vm300_vm0, %v316_v28, %v317_v26  ;;  %v327_v40 = vrot.slane %v1549_v35, 1  ;;  %v324_v41 = vrot.slane %v1553_v37, 1  ;;  %v1569_v46 = vld [vmem:[%s1475_s28 + $0x98] sm:$0xff]  ;;  %v1572_v47 = vld [vmem:[%s1475_s28 + $0xa0] sm:$0x3]  ;;  %v1576_v49 = vld [vmem:[%s1475_s28 + $0x90] sm:$0xff] }
  0x20   : > { %v323_v42 = vsel %vm300_vm0, %v321_v36, %v322_v38  ;;  %v329_v48 = vrot.slane %v1563_v43, 1  ;;  %v332_v50 = vrot.slane %v1569_v46, 1  ;;  %v334_v51 = vrot.slane %v1572_v47, 1  ;;  %v1585_v54 = vld [vmem:[%s1475_s28 + $0xa8] sm:$0xff]  ;;  %v1589_v56 = vld [vmem:[%s1475_s28 + $0xb0] sm:$0xff]  ;;  %v1594_v58 = vld [vmem:[%s1475_s28 + $0xc0] sm:$0xff] }
  0x21   : > { %v328_v44 = vsel %vm300_vm0, %v326_v39, %v327_v40  ;;  %v325_v45 = vsel %vm300_vm0, %v322_v38, %v324_v41  ;;  %v331_v52 = vrot.slane %v1576_v49, 1  ;;  %v1597_v59 = vld [vmem:[%s1475_s28 + $0xc8] sm:$0xff]  ;;  %v336_v60 = vrot.slane %v1585_v54, 1  ;;  %v1601_v61 = vld [vmem:[%s1475_s28 + $0xb8] sm:$0x3]  ;;  %v1617_v12 = vld [vmem:[%s1475_s28 + $0xe0] sm:$0xff] }
  0x22   : > { %v330_v53 = vsel %vm300_vm0, %v327_v40, %v329_v48  ;;  %v335_v55 = vsel %vm300_vm0, %v332_v50, %v334_v51  ;;  %v337_v62 = vrot.slane %v1589_v56, 1  ;;  %v341_v63 = vrot.slane %v1594_v58, 1  ;;  %v1611_v7 = vld [vmem:[%s1475_s28 + $0xd0] sm:$0x3]  ;;  %v1620_v15 = vld [vmem:[%s1475_s28 + $0xe8] sm:$0x3] }
  0x23   : > { %v333_v57 = vsel %vm300_vm0, %v331_v52, %v332_v50  ;;  %v342_v3 = vrot.slane %v1597_v59, 1  ;;  %v339_v4 = vrot.slane %v1601_v61, 1  ;;  %v344_v16 = vrot.slane %v1611_v7, 1  ;;  %v1624_v17 = vld [vmem:[%s1475_s28 + $0xd8] sm:$0xff]  ;;  %v1633_v26 = vld [vmem:[%s1475_s28 + $0xf0] sm:$0xff]  ;;  %v1665_v51 = vld [vmem:[%s1475_s28 + $0x128] sm:$0xff] }
  0x24   : > { %387 = vrot.lane.b32.xlu1 %v310_v20, %s1399_s29  ;;  %v338_v6 = vsel %vm300_vm0, %v336_v60, %v337_v62  ;;  %v347_v19 = vrot.slane %v1617_v12, 1  ;;  %v349_v20 = vrot.slane %v1620_v15, 1  ;;  %v1637_v28 = vld [vmem:[%s1475_s28 + $0xf8] sm:$0xff]  ;;  %v351_v36 = vrot.slane %v1633_v26, 1  ;;  %v1649_v38 = vld [vmem:[%s1475_s28 + $0x100] sm:$0x3] }
  0x25   : > { %383 = vrot.lane.b32.xlu0 %v305_v21, %s1399_s29  ;;  %v343_v9 = vsel %vm300_vm0, %v341_v63, %v342_v3  ;;  %v340_v11 = vsel %vm300_vm0, %v337_v62, %v339_v4  ;;  %v346_v21 = vrot.slane %v1624_v17, 1  ;;  %v345_v24 = vsel %vm300_vm0, %v342_v3, %v344_v16  ;;  %v1668_v52 = vld [vmem:[%s1475_s28 + $0x130] sm:$0x3]  ;;  %v1681_v3 = vld [vmem:[%s1475_s28 + $0x138] sm:$0xff]  ;;  %222 = vst.msk [vmem:[#allocation2 + $0x10] sm:$0xff] %vm219_vm2, %v1478_v0 }
  0x26   : > { %v350_v27 = vsel %vm300_vm0, %v347_v19, %v349_v20  ;;  %v352_v39 = vrot.slane %v1637_v28, 1  ;;  %v364_v60 = vrot.slane %v1668_v52, 1  ;;  %v1693_v16 = vld [vmem:[%s1475_s28 + $0x158] sm:$0xff]  ;;  %v1697_v20 = vld [vmem:[%s1475_s28 + $0x148] sm:$0x3]  ;;  %220 = vst.msk [vmem:[#allocation2] sm:$0xff] %vm219_vm2, %v1484_v2 }
  0x27   : > { %391 = vrot.lane.b32.xlu2 %v315_v29, %s1399_s29  ;;  %v348_v29 = vsel %vm300_vm0, %v346_v21, %v347_v19  ;;  %v366_v19 = vrot.slane %v1681_v3, 1  ;;  %221 = vst.msk [vmem:[#allocation2 + $0x8] sm:$0xff] %vm219_vm2, %v1489_v5 }
  0x28   : > { %223 = vst.msk [vmem:[#allocation2 + $0x18] sm:$0xff] %vm219_vm2, %v1481_v1 }
  0x29   : > { %224 = vst.msk [vmem:[#allocation2 + $0x20] sm:$0xff] %vm219_vm2, %v1505_v13 }
  0x2a   : > { %225 = vst.msk [vmem:[#allocation2 + $0x28] sm:$0xff] %vm219_vm2, %v1508_v14 }
  0x2b   : > { %226 = vst.msk [vmem:[#allocation2 + $0x30] sm:$0xff] %vm219_vm2, %v1528_v25 }
  0x2c   : > { %395 = vrot.lane.b32.xlu1 %v320_v31, %s1399_s29  ;;  %v1642_v31 = vld [vmem:[%s1475_s28 + $0x108] sm:$0xff]  ;;  %227 = vst.msk [vmem:[#allocation2 + $0x38] sm:$0xff] %vm219_vm2, %v1521_v22 }
  0x2d   : > { %393 = vrot.lane.b32.xlu0 %v318_v33, %s1399_s29  ;;  %v1645_v33 = vld [vmem:[%s1475_s28 + $0x110] sm:$0xff]  ;;  %v356_v40 = vrot.slane %v1642_v31, 1  ;;  %228 = vst.msk [vmem:[#allocation2 + $0x40] sm:$0xff] %vm219_vm2, %v1537_v30 }
  0x2e   : > { %v357_v41 = vrot.slane %v1645_v33, 1  ;;  %229 = vst.msk [vmem:[#allocation2 + $0x48] sm:$0xff] %vm219_vm2, %v1541_v32 }
  0x2f   : > { %397 = vrot.lane.b32.xlu2 %v323_v42, %s1399_s29  ;;  %v354_v42 = vrot.slane %v1649_v38, 1  ;;  %230 = vst.msk [vmem:[#allocation2 + $0x50] sm:$0xff] %vm219_vm2, %v1546_v34 }
  0x30   : > { %v358_v48 = vsel %vm300_vm0, %v356_v40, %v357_v41  ;;  %231 = vst.msk [vmem:[#allocation2 + $0x58] sm:$0xff] %vm219_vm2, %v1549_v35 }
  0x31   : > { %v355_v50 = vsel %vm300_vm0, %v352_v39, %v354_v42  ;;  %v1713_v42 = vld [vmem:[%s1475_s28 + $0x170] sm:$0xff]  ;;  %232 = vst.msk [vmem:[#allocation2 + $0x60] sm:$0xff] %vm219_vm2, %v1576_v49 }
  0x32   : > { %233 = vst.msk [vmem:[#allocation2 + $0x68] sm:$0xff] %vm219_vm2, %v1569_v46 }
  0x33   : > { %234 = vst.msk [vmem:[#allocation2 + $0x70] sm:$0xff] %vm219_vm2, %v1585_v54 }
  0x34   : > { %401 = vrot.lane.b32.xlu1 %v328_v44, %s1399_s29  ;;  %v353_v44 = vsel %vm300_vm0, %v351_v36, %v352_v39  ;;  %v1707_v39 = vld [vmem:[%s1475_s28 + $0x160] sm:$0x3]  ;;  %235 = vst.msk [vmem:[#allocation2 + $0x78] sm:$0xff] %vm219_vm2, %v1589_v56 }
  0x35   : > { %399 = vrot.lane.b32.xlu0 %v325_v45, %s1399_s29  ;;  %v1659_v45 = vld [vmem:[%s1475_s28 + $0x118] sm:$0x3]  ;;  %236 = vst.msk [vmem:[#allocation2 + $0x80] sm:$0xff] %vm219_vm2, %v1594_v58 }
  0x36   : > { %237 = vst.msk [vmem:[#allocation2 + $0x88] sm:$0xff] %vm219_vm2, %v1597_v59 }
  0x37   : > { %403 = vrot.lane.b32.xlu2 %v330_v53, %s1399_s29  ;;  %v359_v53 = vrot.slane %v1659_v45, 1  ;;  %238 = vst.msk [vmem:[#allocation2 + $0x90] sm:$0xff] %vm219_vm2, %v1624_v17 }
  0x38   : > { %239 = vst.msk [vmem:[#allocation2 + $0x98] sm:$0xff] %vm219_vm2, %v1617_v12 }
  0x39   : > { %v360_v63 = vsel %vm300_vm0, %v357_v41, %v359_v53  ;;  %v377_v53 = vrot.slane %v1713_v42, 1  ;;  %240 = vst.msk [vmem:[#allocation2 + $0xa0] sm:$0xff] %vm219_vm2, %v1633_v26 }
  0x3a   : > { %241 = vst.msk [vmem:[#allocation2 + $0xa8] sm:$0xff] %vm219_vm2, %v1637_v28 }
  0x3b   : > { %242 = vst.msk [vmem:[#allocation2 + $0xb0] sm:$0xff] %vm219_vm2, %v1642_v31 }
  0x3c   : > { %407 = vrot.lane.b32.xlu1 %v335_v55, %s1399_s29  ;;  %v1672_v55 = vld [vmem:[%s1475_s28 + $0x120] sm:$0xff]  ;;  %243 = vst.msk [vmem:[#allocation2 + $0xb8] sm:$0xff] %vm219_vm2, %v1645_v33 }
  0x3d   : > { %405 = vrot.lane.b32.xlu0 %v333_v57, %s1399_s29  ;;  %v362_v57 = vrot.slane %v1665_v51, 1  ;;  %v361_v62 = vrot.slane %v1672_v55, 1  ;;  %244 = vst.msk [vmem:[#allocation2 + $0xc0] sm:$0xff] %vm219_vm2, %v1672_v55 }
  0x3e   : > { %245 = vst.msk [vmem:[#allocation2 + $0xc8] sm:$0xff] %vm219_vm2, %v1665_v51 }
  0x3f   : > { %409 = vrot.lane.b32.xlu2 %v338_v6, %s1399_s29  ;;  %v365_v4 = vsel %vm300_vm0, %v362_v57, %v364_v60  ;;  %v1685_v6 = vld [vmem:[%s1475_s28 + $0x140] sm:$0xff]  ;;  %246 = vst.msk [vmem:[#allocation2 + $0xd0] sm:$0xff] %vm219_vm2, %v1681_v3 }
  0x40   : > { %v367_v21 = vrot.slane %v1685_v6, 1  ;;  %247 = vst.msk [vmem:[#allocation2 + $0xd8] sm:$0xff] %vm219_vm2, %v1685_v6 }
  0x41   : > { %249 = vst.msk [vmem:[#allocation2 + $0xe8] sm:$0xff] %vm219_vm2, %v1693_v16 }
  0x42   : > { %v368_v36 = vsel %vm300_vm0, %v366_v19, %v367_v21  ;;  %v512_v19 = vrot.slane %v1489_v5, 2  ;;  %v524_v5 = vrot.slane %v1514_v18, 2  ;;  %251 = vst.msk [vmem:[#allocation2 + $0xf8] sm:$0xff] %vm219_vm2, %v1713_v42 }
  0x44   : > { %413 = vrot.lane.b32.xlu1 %v343_v9, %s1399_s29  ;;  %v363_v9 = vsel %vm300_vm0, %v361_v62, %v362_v57 }
  0x45   : > { %411 = vrot.lane.b32.xlu0 %v340_v11, %s1399_s29  ;;  %v1690_v11 = vld [vmem:[%s1475_s28 + $0x150] sm:$0xff] }
  0x46   : > { %248 = vst.msk [vmem:[#allocation2 + $0xe0] sm:$0xff] %vm219_vm2, %v1690_v11 }
  0x47   : > { %415 = vrot.lane.b32.xlu2 %v345_v24, %s1399_s29  ;;  %v371_v24 = vrot.slane %v1690_v11, 1 }
  0x4c   : > { %419 = vrot.lane.b32.xlu1 %v350_v27, %s1399_s29  ;;  %v372_v27 = vrot.slane %v1693_v16, 1 }
  0x4d   : > { %417 = vrot.lane.b32.xlu0 %v348_v29, %s1399_s29  ;;  %v369_v29 = vrot.slane %v1697_v20, 1 }
  0x4e   : > { %v373_v40 = vsel %vm300_vm0, %v371_v24, %v372_v27  ;;  %v517_v24 = vrot.slane %v1481_v1, 2 }
  0x4f   : > { %421 = vrot.lane.b32.xlu2 %v353_v44, %s1399_s29  ;;  %v370_v41 = vsel %vm300_vm0, %v367_v21, %v369_v29  ;;  %v1716_v44 = vld [vmem:[%s1475_s28 + $0x178] sm:$0x3]  ;;  %v516_v21 = vrot.slane %v1478_v0, 2 }
  0x50   : > { %v379_v57 = vrot.slane %v1716_v44, 1 }
  0x54   : > { %425 = vrot.lane.b32.xlu1 %v358_v48, %s1399_s29  ;;  %v374_v48 = vrot.slane %v1707_v39, 1 }
  0x55   : > { %423 = vrot.lane.b32.xlu0 %v355_v50, %s1399_s29  ;;  %v1720_v50 = vld [vmem:[%s1475_s28 + $0x168] sm:$0xff] }
  0x56   : > { %v376_v60 = vrot.slane %v1720_v50, 1  ;;  %v375_v62 = vsel %vm300_vm0, %v372_v27, %v374_v48  ;;  %v514_v27 = vrot.slane %v1498_v10, 2  ;;  %250 = vst.msk [vmem:[#allocation2 + $0xf0] sm:$0xff] %vm219_vm2, %v1720_v50 }
  0x57   : > { %427 = vrot.lane.b32.xlu2 %v360_v63, %s1399_s29  ;;  %v380_v63 = vsel %vm300_vm0, %v377_v53, %v379_v57 }
  0x58   : > { %v515_v10 = vsel %vm510_vm1, %v512_v19, %v514_v27  ;;  %v556_v27 = vrot.slane %v1624_v17, 2 }
  0x5c   : > { %431 = vrot.lane.b32.xlu1 %v365_v4, %s1399_s29  ;;  %v378_v4 = vsel %vm300_vm0, %v376_v60, %v377_v53  ;;  %v551_v53 = vrot.slane %v1594_v58, 2  ;;  %v552_v60 = vrot.slane %v1597_v59, 2 }
  0x5d   : > { %429 = vrot.lane.b32.xlu0 %v363_v9, %s1399_s29  ;;  %v511_v9 = vrot.slane %v1484_v2, 2  ;;  %v522_v2 = vrot.slane %v1508_v14, 2 }
  0x5f   : > { %433 = vrot.lane.b32.xlu2 %v368_v36, %s1399_s29  ;;  %v513_v29 = vsel %vm510_vm1, %v511_v9, %v512_v19  ;;  %v518_v36 = vsel %vm510_vm1, %v516_v21, %v517_v24  ;;  %v525_v48 = vsel %vm510_vm1, %v522_v2, %v524_v5  ;;  %v554_v21 = vrot.slane %v1611_v7, 2 }
  0x60   : > { %v559_v5 = vrot.slane %v1620_v15, 2  ;;  %v531_v15 = vrot.slane %v1537_v30, 2 }
  0x64   : > { %437 = vrot.lane.b32.xlu1 %v373_v40, %s1399_s29  ;;  %v519_v40 = vrot.slane %v1494_v8, 2 }
  0x65   : > { %435 = vrot.lane.b32.xlu0 %v370_v41, %s1399_s29  ;;  %v521_v41 = vrot.slane %v1505_v13, 2 }
  0x66   : > { %v520_v8 = vsel %vm510_vm1, %v517_v24, %v519_v40  ;;  %v555_v24 = vsel %vm510_vm1, %v552_v60, %v554_v21 }
  0x67   : > { %439 = vrot.lane.b32.xlu2 %v375_v62, %s1399_s29  ;;  %v523_v18 = vsel %vm510_vm1, %v521_v41, %v522_v2  ;;  %v526_v62 = vrot.slane %v1528_v25, 2 }
  0x6c   : > { %443 = vrot.lane.b32.xlu1 %v380_v63, %s1399_s29  ;;  %v527_v63 = vrot.slane %v1521_v22, 2 }
  0x6d   : > { %441 = vrot.lane.b32.xlu0 %v378_v4, %s1399_s29  ;;  %v553_v4 = vsel %vm510_vm1, %v551_v53, %v552_v60  ;;  %s1166_s29 = scalar_lea.sflag [#allocation4], %s161_s11 }
  0x6e   : > { %v528_v9 = vsel %vm510_vm1, %v526_v62, %v527_v63  ;;  %v561_v62 = vrot.slane %v1633_v26, 2 }
  0x6f   : > { %591 = vrot.lane.b32.xlu2 %v513_v29, %s1400_s30  ;;  %v557_v29 = vrot.slane %v1617_v12, 2 }
  0x74   : > { %595 = vrot.lane.b32.xlu1 %v518_v36, %s1400_s30 }
  0x75   : > { %593 = vrot.lane.b32.xlu0 %v515_v10, %s1400_s30  ;;  %v558_v10 = vsel %vm510_vm1, %v556_v27, %v557_v29 }
  0x77   : > { %597 = vrot.lane.b32.xlu2 %v520_v8, %s1400_s30  ;;  %v560_v8 = vsel %vm510_vm1, %v557_v29, %v559_v5 }
  0x79   : > { %v390_v57 = vpop.permute.xlu2 %389 }
  0x7a   : > { %482 = vst.msk [vmem:[#allocation2 + $0x20] sm:$0xff] %vm477_vm3, %v390_v57 }
  0x7c   : > { %601 = vrot.lane.b32.xlu1 %v525_v48, %s1400_s30 }
  0x7d   : > { %599 = vrot.lane.b32.xlu0 %v523_v18, %s1400_s30  ;;  %v532_v18 = vrot.slane %v1541_v32, 2 }
  0x7f   : > { %623 = vrot.lane.b32.xlu2 %v553_v4, %s1400_s30  ;;  %v562_v4 = vrot.slane %v1637_v28, 2 }
  0x81   : > { %v392_v19 = vpop.permute.xlu2 %391  ;;  %v563_v21 = vsel %vm510_vm1, %v561_v62, %v562_v4  ;;  %v884_v62 = vld [vmem:[%s2185_s1 + $0x8] sm:$0xff] }
  0x82   : > { %483 = vst.msk [vmem:[#allocation2 + $0x28] sm:$0xff] %vm477_vm3, %v392_v19  ;;  %1286 = vmatpush.msra.mxu2 %v884_v62  ;;  %1000 = vmatpush.msra.mxu0 %v884_v62 }
  0x83   : > { %1287 = vmatpush.msra.mxu3 %v884_v62  ;;  %1285 = vmatpush.msra.mxu1 %v884_v62 }
  0x84   : > { %603 = vrot.lane.b32.xlu1 %v528_v9, %s1400_s30 }
  0x85   : > { %754 = vrot.lane.b32.xlu0 %v1624_v17, %s1401_s4  ;;  %v572_v17 = vrot.slane %v1665_v51, 2 }
  0x87   : > { %722 = vrot.lane.b32.xlu2 %v1478_v0, %s1401_s4 }
  0x89   : > { %v398_v7 = vpop.permute.xlu2 %397 }
  0x8a   : > { %486 = vst.msk [vmem:[#allocation2 + $0x40] sm:$0xff] %vm477_vm3, %v398_v7 }
  0x8c   : > { %756 = vrot.lane.b32.xlu1 %v1617_v12, %s1401_s4  ;;  %v571_v12 = vrot.slane %v1672_v55, 2 }
  0x8d   : > { %625 = vrot.lane.b32.xlu0 %v555_v24, %s1400_s30  ;;  %v574_v24 = vrot.slane %v1668_v52, 2 }
  0x8e   : > { %v386_v0 = vpop.permute.xlu1 %385  ;;  %v573_v41 = vsel %vm510_vm1, %v571_v12, %v572_v17  ;;  %v576_v12 = vrot.slane %v1681_v3, 2 }
  0x8f   : > { %480 = vst.msk [vmem:[#allocation2 + $0x10] sm:$0xff] %vm477_vm3, %v386_v0  ;;  %v382_v36 = vpop.permute.xlu0 %381  ;;  %724 = vrot.lane.b32.xlu2 %v1481_v1, %s1401_s4 }
  0x90   : > { %478 = vst.msk [vmem:[#allocation2] sm:$0xff] %vm477_vm3, %v382_v36 }
  0x91   : > { %v404_v40 = vpop.permute.xlu2 %403 }
  0x92   : > { %489 = vst.msk [vmem:[#allocation2 + $0x58] sm:$0xff] %vm477_vm3, %v404_v40 }
  0x94   : > { %758 = vrot.lane.b32.xlu1 %v1633_v26, %s1401_s4 }
  0x95   : > { %627 = vrot.lane.b32.xlu0 %v558_v10, %s1400_s30 }
  0x96   : > { %v388_v2 = vpop.permute.xlu1 %387 }
  0x97   : > { %481 = vst.msk [vmem:[#allocation2 + $0x18] sm:$0xff] %vm477_vm3, %v388_v2  ;;  %v384_v1 = vpop.permute.xlu0 %383  ;;  %726 = vrot.lane.b32.xlu2 %v1505_v13, %s1401_s4  ;;  %v533_v13 = vsel %vm510_vm1, %v531_v15, %v532_v18  ;;  %v566_v15 = vrot.slane %v1642_v31, 2 }
  0x98   : > { %479 = vst.msk [vmem:[#allocation2 + $0x8] sm:$0xff] %vm477_vm3, %v384_v1 }
  0x99   : > { %v410_v48 = vpop.permute.xlu2 %409 }
  0x9a   : > { %492 = vst.msk [vmem:[#allocation2 + $0x70] sm:$0xff] %vm477_vm3, %v410_v48 }
  0x9c   : > { %639 = vrot.lane.b32.xlu1 %v573_v41, %s1400_s30 }
  0x9d   : > { %629 = vrot.lane.b32.xlu0 %v560_v8, %s1400_s30 }
  0x9e   : > { %v396_v53 = vpop.permute.xlu1 %395 }
  0x9f   : > { %485 = vst.msk [vmem:[#allocation2 + $0x38] sm:$0xff] %vm477_vm3, %v396_v53  ;;  %v394_v57 = vpop.permute.xlu0 %393  ;;  %760 = vrot.lane.b32.xlu2 %v1637_v28, %s1401_s4  ;;  %v575_v28 = vsel %vm510_vm1, %v572_v17, %v574_v24  ;;  %v577_v17 = vrot.slane %v1685_v6, 2 }
  0xa0   : > { %484 = vst.msk [vmem:[#allocation2 + $0x30] sm:$0xff] %vm477_vm3, %v394_v57 }
  0xa1   : > { %v416_v60 = vpop.permute.xlu2 %415 }
  0xa2   : > { %495 = vst.msk [vmem:[#allocation2 + $0x88] sm:$0xff] %vm477_vm3, %v416_v60 }
  0xa4   : > { %607 = vrot.lane.b32.xlu1 %v533_v13, %s1400_s30 }
  0xa5   : > { %770 = vrot.lane.b32.xlu0 %v1681_v3, %s1401_s4  ;;  %v536_v3 = vrot.slane %v1546_v34, 2 }
  0xa6   : > { %v402_v9 = vpop.permute.xlu1 %401 }
  0xa7   : > { %488 = vst.msk [vmem:[#allocation2 + $0x50] sm:$0xff] %vm477_vm3, %v402_v9  ;;  %v400_v19 = vpop.permute.xlu0 %399  ;;  %728 = vrot.lane.b32.xlu2 %v1508_v14, %s1401_s4  ;;  %v534_v14 = vrot.slane %v1553_v37, 2  ;;  %v564_v37 = vrot.slane %v1649_v38, 2  ;;  %v578_v38 = vsel %vm510_vm1, %v576_v12, %v577_v17 }
  0xa8   : > { %487 = vst.msk [vmem:[#allocation2 + $0x48] sm:$0xff] %vm477_vm3, %v400_v19 }
  0xa9   : > { %v422_v7 = vpop.permute.xlu2 %421  ;;  %v535_v29 = vsel %vm510_vm1, %v532_v18, %v534_v14  ;;  %v565_v2 = vsel %vm510_vm1, %v562_v4, %v564_v37  ;;  %v567_v18 = vrot.slane %v1645_v33, 2 }
  0xaa   : > { %498 = vst.msk [vmem:[#allocation2 + $0xa0] sm:$0xff] %vm477_vm3, %v422_v7  ;;  %v582_v7 = vrot.slane %v1693_v16, 2 }
  0xab   : > { %v568_v13 = vsel %vm510_vm1, %v566_v15, %v567_v18  ;;  %v549_v15 = vrot.slane %v1601_v61, 2 }
  0xac   : > { %631 = vrot.lane.b32.xlu1 %v563_v21, %s1400_s30 }
  0xad   : > { %738 = vrot.lane.b32.xlu0 %v1546_v34, %s1401_s4  ;;  %v579_v34 = vrot.slane %v1697_v20, 2 }
  0xae   : > { %v408_v26 = vpop.permute.xlu1 %407 }
  0xaf   : > { %491 = vst.msk [vmem:[#allocation2 + $0x68] sm:$0xff] %vm477_vm3, %v408_v26  ;;  %v406_v0 = vpop.permute.xlu0 %405  ;;  %641 = vrot.lane.b32.xlu2 %v575_v28, %s1400_s30  ;;  %v580_v57 = vsel %vm510_vm1, %v577_v17, %v579_v34 }
  0xb0   : > { %490 = vst.msk [vmem:[#allocation2 + $0x60] sm:$0xff] %vm477_vm3, %v406_v0 }
  0xb1   : > { %v428_v52 = vpop.permute.xlu2 %427 }
  0xb2   : > { %501 = vst.msk [vmem:[#allocation2 + $0xb8] sm:$0xff] %vm477_vm3, %v428_v52 }
  0xb4   : > { %772 = vrot.lane.b32.xlu1 %v1685_v6, %s1401_s4  ;;  %v537_v6 = vrot.slane %v1549_v35, 2 }
  0xb5   : > { %762 = vrot.lane.b32.xlu0 %v1642_v31, %s1401_s4  ;;  %v539_v31 = vrot.slane %v1563_v43, 2  ;;  %v569_v43 = vrot.slane %v1659_v45, 2  ;;  %v581_v45 = vrot.slane %v1690_v11, 2 }
  0xb6   : > { %v414_v27 = vpop.permute.xlu1 %413  ;;  %v538_v8 = vsel %vm510_vm1, %v536_v3, %v537_v6 }
  0xb7   : > { %494 = vst.msk [vmem:[#allocation2 + $0x80] sm:$0xff] %vm477_vm3, %v414_v27  ;;  %v412_v36 = vpop.permute.xlu0 %411  ;;  %609 = vrot.lane.b32.xlu2 %v535_v29, %s1400_s30  ;;  %v540_v4 = vsel %vm510_vm1, %v537_v6, %v539_v31  ;;  %v570_v24 = vsel %vm510_vm1, %v567_v18, %v569_v43  ;;  %v583_v0 = vsel %vm510_vm1, %v581_v45, %v582_v7  ;;  %v542_v29 = vrot.slane %v1569_v46, 2  ;;  %v217_v31 = vld [vmem:[%s1475_s28 + $0x180] sm:$0xff] }
  0xb8   : > { %493 = vst.msk [vmem:[#allocation2 + $0x78] sm:$0xff] %vm477_vm3, %v412_v36  ;;  %v546_v6 = vrot.slane %v1585_v54, 2  ;;  %v544_v18 = vrot.slane %v1572_v47, 2 }
  0xb9   : > { %v434_v10 = vpop.permute.xlu2 %433 }
  0xba   : > { %504 = vst.msk [vmem:[#allocation2 + $0xd0] sm:$0xff] %vm477_vm3, %v434_v10 }
  0xbc   : > { %740 = vrot.lane.b32.xlu1 %v1549_v35, %s1401_s4 }
  0xbd   : > { %730 = vrot.lane.b32.xlu0 %v1528_v25, %s1401_s4 }
  0xbe   : > { %v420_v40 = vpop.permute.xlu1 %419 }
  0xbf   : > { %497 = vst.msk [vmem:[#allocation2 + $0x98] sm:$0xff] %vm477_vm3, %v420_v40  ;;  %v418_v5 = vpop.permute.xlu0 %417  ;;  %633 = vrot.lane.b32.xlu2 %v565_v2, %s1400_s30 }
  0xc0   : > { %496 = vst.msk [vmem:[#allocation2 + $0x90] sm:$0xff] %vm477_vm3, %v418_v5  ;;  %v586_v5 = vrot.slane %v1720_v50, 2 }
  0xc1   : > { %v440_v1 = vpop.permute.xlu2 %439 }
  0xc2   : > { %507 = vst.msk [vmem:[#allocation2 + $0xe8] sm:$0xff] %vm477_vm3, %v440_v1 }
  0xc4   : > { %764 = vrot.lane.b32.xlu1 %v1645_v33, %s1401_s4 }
  0xc5   : > { %643 = vrot.lane.b32.xlu0 %v578_v38, %s1400_s30  ;;  %v587_v38 = vrot.slane %v1713_v42, 2 }
  0xc6   : > { %v426_v25 = vpop.permute.xlu1 %425 }
  0xc7   : > { %500 = vst.msk [vmem:[#allocation2 + $0xb0] sm:$0xff] %vm477_vm3, %v426_v25  ;;  %v424_v41 = vpop.permute.xlu0 %423  ;;  %774 = vrot.lane.b32.xlu2 %v1690_v11, %s1401_s4  ;;  %v529_v11 = vrot.slane %v1524_v23, 2  ;;  %v541_v23 = vrot.slane %v1576_v49, 2  ;;  %v588_v1 = vsel %vm510_vm1, %v586_v5, %v587_v38 }
  0xc8   : > { %499 = vst.msk [vmem:[#allocation2 + $0xa8] sm:$0xff] %vm477_vm3, %v424_v41  ;;  %v547_v41 = vrot.slane %v1589_v56, 2 }
  0xc9   : > { %v592_v48 = vpop.permute.xlu2 %591  ;;  %v530_v27 = vsel %vm510_vm1, %v527_v63, %v529_v11 }
  0xca   : > { %688 = vst.msk [vmem:[#allocation2] sm:$0xff] %vm687_vm4, %v592_v48 }
  0xcc   : > { %732 = vrot.lane.b32.xlu1 %v1521_v22, %s1401_s4 }
  0xcd   : > { %611 = vrot.lane.b32.xlu0 %v538_v8, %s1400_s30  ;;  %v548_v8 = vsel %vm510_vm1, %v546_v6, %v547_v41  ;;  %v2093_v6 = vld [vmem:[%s2186_s2] ss:$0 sm:$0xff] }
  0xce   : > { %v432_v35 = vpop.permute.xlu1 %431 }
  0xcf   : > { %503 = vst.msk [vmem:[#allocation2 + $0xc8] sm:$0xff] %vm477_vm3, %v432_v35  ;;  %v430_v53 = vpop.permute.xlu0 %429  ;;  %742 = vrot.lane.b32.xlu2 %v1576_v49, %s1401_s4  ;;  %v584_v49 = vrot.slane %v1707_v39, 2 }
  0xd0   : > { %502 = vst.msk [vmem:[#allocation2 + $0xc0] sm:$0xff] %vm477_vm3, %v430_v53  ;;  %v218_v53 = vld [vmem:[%s1475_s28 + $0x188] sm:$0xff]  ;;  %s1181_s28 = sshll.u32 %s1177_s25, 4  ;;  %s1182_s28 = int_to_ptr.hbm [resolvable:$true] %s1181_s28 }
  0xd1   : > { %v598_v60 = vpop.permute.xlu2 %597  ;;  %v585_v40 = vsel %vm510_vm1, %v582_v7, %v584_v49 }
  0xd2   : > { %691 = vst.msk [vmem:[#allocation2 + $0x18] sm:$0xff] %vm687_vm4, %v598_v60 }
  0xd4   : > { %645 = vrot.lane.b32.xlu1 %v580_v57, %s1400_s30  ;;  %v545_v57 = vsel %vm510_vm1, %v542_v29, %v544_v18 }
  0xd5   : > { %635 = vrot.lane.b32.xlu0 %v568_v13, %s1400_s30 }
  0xd6   : > { %v438_v33 = vpop.permute.xlu1 %437 }
  0xd7   : > { %506 = vst.msk [vmem:[#allocation2 + $0xe0] sm:$0xff] %vm477_vm3, %v438_v33  ;;  %v436_v20 = vpop.permute.xlu0 %435  ;;  %766 = vrot.lane.b32.xlu2 %v1672_v55, %s1401_s4  ;;  %v883_v55 = vld [vmem:[%s2185_s1] sm:$0xff] }
  0xd8   : > { %505 = vst.msk [vmem:[#allocation2 + $0xd8] sm:$0xff] %vm477_vm3, %v436_v20  ;;  %1289 = vmatpush.msra.mxu2 %v883_v55  ;;  %1001 = vmatpush.msra.mxu0 %v883_v55 }
  0xd9   : > { %v624_v9 = vpop.permute.xlu2 %623  ;;  %1290 = vmatpush.msra.mxu3 %v883_v55  ;;  %1288 = vmatpush.msra.mxu1 %v883_v55 }
  0xda   : > { %704 = vst.msk [vmem:[#allocation2 + $0x80] sm:$0xff] %vm687_vm4, %v624_v9 }
  0xdc   : > { %613 = vrot.lane.b32.xlu1 %v540_v4, %s1400_s30  ;;  %v589_v4 = vrot.slane %v1716_v44, 2 }
  0xdd   : > { %776 = vrot.lane.b32.xlu0 %v1693_v16, %s1401_s4 }
  0xde   : > { %v444_v19 = vpop.permute.xlu1 %443  ;;  %v590_v9 = vsel %vm510_vm1, %v587_v38, %v589_v4 }
  0xdf   : > { %509 = vst.msk [vmem:[#allocation2 + $0xf8] sm:$0xff] %vm477_vm3, %v444_v19  ;;  %v442_v21 = vpop.permute.xlu0 %441  ;;  %734 = vrot.lane.b32.xlu2 %v1537_v30, %s1401_s4 }
  0xe0   : > { %508 = vst.msk [vmem:[#allocation2 + $0xf0] sm:$0xff] %vm477_vm3, %v442_v21 }
  0xe1   : > { %v723_v26 = vpop.permute.xlu2 %722 }
  0xe2   : > { %819 = vst.msk [vmem:[#allocation2] sm:$0xff] %vm818_vm5, %v723_v26 }
  0xe4   : > { %637 = vrot.lane.b32.xlu1 %v570_v24, %s1400_s30 }
  0xe5   : > { %744 = vrot.lane.b32.xlu0 %v1569_v46, %s1401_s4 }
  0xe6   : > { %v596_v28 = vpop.permute.xlu1 %595 }
  0xe7   : > { %690 = vst.msk [vmem:[#allocation2 + $0x10] sm:$0xff] %vm687_vm4, %v596_v28  ;;  %v594_v30 = vpop.permute.xlu0 %593  ;;  %647 = vrot.lane.b32.xlu2 %v583_v0, %s1400_s30 }
  0xe8   : > { %689 = vst.msk [vmem:[#allocation2 + $0x8] sm:$0xff] %vm687_vm4, %v594_v30 }
  0xe9   : > { %v725_v16 = vpop.permute.xlu2 %724  ;;  %v851_v14 = vld [vmem:[#allocation2] sm:$0xff] }
  0xea   : > { %820 = vst.msk [vmem:[#allocation2 + $0x8] sm:$0xff] %vm818_vm5, %v725_v16  ;;  %1247 = vmatmul.msk.f32.vlgmr.msra.gmra.mxu0 %vm889_vm6, %v851_v14 }
  0xec   : > { %778 = vrot.lane.b32.xlu1 %v1720_v50, %s1401_s4 }
  0xed   : > { %768 = vrot.lane.b32.xlu0 %v1665_v51, %s1401_s4  ;;  %v543_v51 = vsel %vm510_vm1, %v541_v23, %v542_v29 }
  0xee   : > { %v602_v52 = vpop.permute.xlu1 %601 }
  0xef   : > { %693 = vst.msk [vmem:[#allocation2 + $0x28] sm:$0xff] %vm687_vm4, %v602_v52  ;;  %v600_v36 = vpop.permute.xlu0 %599  ;;  %605 = vrot.lane.b32.xlu2 %v530_v27, %s1400_s30 }
  0xf0   : > { %692 = vst.msk [vmem:[#allocation2 + $0x20] sm:$0xff] %vm687_vm4, %v600_v36 }
  0xf1   : > { %v727_v37 = vpop.permute.xlu2 %726  ;;  %v852_v10 = vld [vmem:[#allocation2 + $0x8] sm:$0xff] }
  0xf2   : > { %821 = vst.msk [vmem:[#allocation2 + $0x10] sm:$0xff] %vm818_vm5, %v727_v37  ;;  %1248 = vmatmul.msk.f32.gmra.mxu0 %vm889_vm6, %v852_v10 }
  0xf4   : > { %736 = vrot.lane.b32.xlu1 %v1541_v32, %s1401_s4 }
  0xf5   : > { %615 = vrot.lane.b32.xlu0 %v543_v51, %s1400_s30 }
  0xf6   : > { %v604_v22 = vpop.permute.xlu1 %603 }
  0xf7   : > { %694 = vst.msk [vmem:[#allocation2 + $0x30] sm:$0xff] %vm687_vm4, %v604_v22  ;;  %v755_v63 = vpop.permute.xlu0 %754  ;;  %746 = vrot.lane.b32.xlu2 %v1585_v54, %s1401_s4 }
  0xf8   : > { %835 = vst.msk [vmem:[#allocation2 + $0x80] sm:$0xff] %vm818_vm5, %v755_v63 }
  0xf9   : > { %v761_v32 = vpop.permute.xlu2 %760  ;;  %v853_v12 = vld [vmem:[#allocation2 + $0x10] sm:$0xff] }
  0xfa   : > { %1249 = vmatmul.msk.f32.gmra.mxu0 %vm889_vm6, %v853_v12 }
  0xfc   : > { %780 = vrot.lane.b32.xlu1 %v1713_v42, %s1401_s4 }
  0xfd   : > { %649 = vrot.lane.b32.xlu0 %v585_v40, %s1400_s30 }
  0xfe   : > { %v757_v39 = vpop.permute.xlu1 %756 }
  0xff   : > { %v626_v17 = vpop.permute.xlu0 %625  ;;  %v867_v2 = vld [vmem:[#allocation2 + $0x80] sm:$0xff]  ;;  %617 = vrot.lane.b32.xlu2 %v545_v57, %s1400_s30 }
 0x100   : > { %705 = vst.msk [vmem:[#allocation2 + $0x88] sm:$0xff] %vm687_vm4, %v626_v17  ;;  %1263 = vmatmul.msk.f32.vlgmr.msra.gmra.mxu2 %vm889_vm6, %v867_v2 }
 0x101   : > { %836 = vst.msk [vmem:[#allocation2 + $0x88] sm:$0xff] %vm818_vm5, %v757_v39  ;;  %v729_v25 = vpop.permute.xlu2 %728 }
 0x102   : > { %822 = vst.msk [vmem:[#allocation2 + $0x18] sm:$0xff] %vm818_vm5, %v729_v25 }
 0x104   : > { %651 = vrot.lane.b32.xlu1 %v588_v1, %s1400_s30 }
 0x105   : > { %748 = vrot.lane.b32.xlu0 %v1589_v56, %s1401_s4 }
 0x106   : > { %v759_v3 = vpop.permute.xlu1 %758 }
 0x107   : > { %v628_v50 = vpop.permute.xlu0 %627  ;;  %782 = vrot.lane.b32.xlu2 %v217_v31, %s1401_s4 }
 0x108   : > { %706 = vst.msk [vmem:[#allocation2 + $0x90] sm:$0xff] %vm687_vm4, %v628_v50  ;;  %v868_v42 = vld [vmem:[#allocation2 + $0x88] sm:$0xff] }
 0x109   : > { %837 = vst.msk [vmem:[#allocation2 + $0x90] sm:$0xff] %vm818_vm5, %v759_v3  ;;  %1264 = vmatmul.msk.f32.gmra.mxu2 %vm889_vm6, %v868_v42  ;;  %v642_v48 = vpop.permute.xlu2 %641  ;;  %v854_v34 = vld [vmem:[#allocation2 + $0x18] sm:$0xff] }
 0x10a   : > { %713 = vst.msk [vmem:[#allocation2 + $0xc8] sm:$0xff] %vm687_vm4, %v642_v48  ;;  %1250 = vmatmul.msk.f32.gmra.mxu0 %vm889_vm6, %v854_v34 }
 0x10c   : > { %750 = vrot.lane.b32.xlu1 %v1594_v58, %s1401_s4  ;;  %v550_v58 = vsel %vm510_vm1, %v547_v41, %v549_v15 }
 0x10d   : > { %619 = vrot.lane.b32.xlu0 %v548_v8, %s1400_s30 }
 0x10e   : > { %v640_v54 = vpop.permute.xlu1 %639 }
 0x10f   : > { %712 = vst.msk [vmem:[#allocation2 + $0xc0] sm:$0xff] %vm687_vm4, %v640_v54  ;;  %v630_v56 = vpop.permute.xlu0 %629  ;;  %653 = vrot.lane.b32.xlu2 %v590_v9, %s1400_s30 }
 0x110   : > { %707 = vst.msk [vmem:[#allocation2 + $0x98] sm:$0xff] %vm687_vm4, %v630_v56  ;;  %v869_v35 = vld [vmem:[#allocation2 + $0x90] sm:$0xff] }
 0x111   : > { %1265 = vmatmul.msk.f32.gmra.mxu2 %vm889_vm6, %v869_v35  ;;  %838 = vst.msk [vmem:[#allocation2 + $0x98] sm:$0xff] %vm818_vm5, %v761_v32  ;;  %v610_v13 = vpop.permute.xlu2 %609 }
 0x112   : > { %697 = vst.msk [vmem:[#allocation2 + $0x48] sm:$0xff] %vm687_vm4, %v610_v13 }
 0x114   : > { %621 = vrot.lane.b32.xlu1 %v550_v58, %s1400_s30  ;;  %s1349_s30 = sshra.s32 %s1182_s28, 4  ;;  %s1350_s30 = int_to_ptr.hbm [resolvable:$true] %s1349_s30 }
 0x115   : > { %784 = vrot.lane.b32.xlu0 %v218_v53, %s1401_s4  ;;  %p1356_p0 = scmp.lt.s32.totalorder %s1350_s30, %s2187_s3 }
 0x116   : > { %v608_v47 = vpop.permute.xlu1 %607 }
 0x117   : > { %696 = vst.msk [vmem:[#allocation2 + $0x40] sm:$0xff] %vm687_vm4, %v608_v47  ;;  %v771_v61 = vpop.permute.xlu0 %770  ;;  %752 = vrot.lane.b32.xlu2 %v1597_v59, %s1401_s4  ;;  %s1351_s4 = scalar_lea.hbm %s1350_s30, 16 }
 0x118   : > { %843 = vst.msk [vmem:[#allocation2 + $0xc0] sm:$0xff] %vm818_vm5, %v771_v61  ;;  %v870_v60 = vld [vmem:[#allocation2 + $0x98] sm:$0xff]  ;;  %p1352_p11 = scmp.ne.s32.totalorder %s1350_s30, %s1351_s4  ;;  %p1357_p1 = scmp.lt.s32.totalorder %s1355_s6, %s1351_s4 }
 0x119   : > { %1266 = vmatmul.msk.f32.gmra.mxu2 %vm889_vm6, %v870_v60  ;;  %v634_v46 = vpop.permute.xlu2 %633 }
 0x11a   : > { %709 = vst.msk [vmem:[#allocation2 + $0xa8] sm:$0xff] %vm687_vm4, %v634_v46  ;;  %p1353_p12 = pnand %p1352_p11, %p1460_p5  ;;  %p1358_p2 = por %p1357_p1, %p1356_p0 }
 0x11c   : > { %p1354_p13 = pneg %p1353_p12 }
 0x11e   : > { %v632_v33 = vpop.permute.xlu1 %631  ;;  %p1359_p3 = pnand %p1358_p2, %p1354_p13 }
 0x11f   : > { %708 = vst.msk [vmem:[#allocation2 + $0xa0] sm:$0xff] %vm687_vm4, %v632_v33  ;;  %v739_v20 = vpop.permute.xlu0 %738  ;;  %v875_v62 = vld [vmem:[#allocation2 + $0xc0] sm:$0xff] }
 0x120   : > { %827 = vst.msk [vmem:[#allocation2 + $0x40] sm:$0xff] %vm818_vm5, %v739_v20  ;;  %1271 = vmatmul.msk.f32.vlgmr.msra.gmra.mxu3 %vm889_vm6, %v875_v62 }
 0x121   : > { %v775_v43 = vpop.permute.xlu2 %774 }
 0x126   : > { %v773_v19 = vpop.permute.xlu1 %772 }
 0x127   : > { %844 = vst.msk [vmem:[#allocation2 + $0xc8] sm:$0xff] %vm818_vm5, %v773_v19  ;;  %v763_v21 = vpop.permute.xlu0 %762  ;;  %v859_v55 = vld [vmem:[#allocation2 + $0x40] sm:$0xff] }
 0x128   : > { %839 = vst.msk [vmem:[#allocation2 + $0xa0] sm:$0xff] %vm818_vm5, %v763_v21  ;;  %1255 = vmatmul.msk.f32.vlgmr.msra.gmra.mxu1 %vm889_vm6, %v859_v55 }
 0x129   : > { %v743_v24 = vpop.permute.xlu2 %742 }
 0x12e   : > { %v741_v45 = vpop.permute.xlu1 %740  ;;  %v876_v44 = vld [vmem:[#allocation2 + $0xc8] sm:$0xff] }
 0x12f   : > { %828 = vst.msk [vmem:[#allocation2 + $0x48] sm:$0xff] %vm818_vm5, %v741_v45  ;;  %v731_v7 = vpop.permute.xlu0 %730  ;;  %1272 = vmatmul.msk.f32.gmra.mxu3 %vm889_vm6, %v876_v44  ;;  %v871_v26 = vld [vmem:[#allocation2 + $0xa0] sm:$0xff] }
 0x130   : > { %823 = vst.msk [vmem:[#allocation2 + $0x20] sm:$0xff] %vm818_vm5, %v731_v7  ;;  %1267 = vmatmul.msk.f32.gmra.mxu2 %vm889_vm6, %v871_v26 }
 0x131   : > { %v767_v28 = vpop.permute.xlu2 %766 }
 0x136   : > { %v765_v0 = vpop.permute.xlu1 %764  ;;  %v860_v30 = vld [vmem:[#allocation2 + $0x48] sm:$0xff] }
 0x137   : > { %840 = vst.msk [vmem:[#allocation2 + $0xa8] sm:$0xff] %vm818_vm5, %v765_v0  ;;  %v644_v11 = vpop.permute.xlu0 %643  ;;  %1256 = vmatmul.msk.f32.gmra.mxu1 %vm889_vm6, %v860_v30  ;;  %v855_v59 = vld [vmem:[#allocation2 + $0x20] sm:$0xff] }
 0x138   : > { %714 = vst.msk [vmem:[#allocation2 + $0xd0] sm:$0xff] %vm687_vm4, %v644_v11  ;;  %1251 = vmatmul.msk.f32.gmra.mxu0 %vm889_vm6, %v855_v59 }
 0x139   : > { %845 = vst.msk [vmem:[#allocation2 + $0xd0] sm:$0xff] %vm818_vm5, %v775_v43  ;;  %v735_v16 = vpop.permute.xlu2 %734 }
 0x13a   : > { %825 = vst.msk [vmem:[#allocation2 + $0x30] sm:$0xff] %vm818_vm5, %v735_v16 }
 0x13e   : > { %v733_v14 = vpop.permute.xlu1 %732  ;;  %v872_v52 = vld [vmem:[#allocation2 + $0xa8] sm:$0xff] }
 0x13f   : > { %824 = vst.msk [vmem:[#allocation2 + $0x28] sm:$0xff] %vm818_vm5, %v733_v14  ;;  %v612_v27 = vpop.permute.xlu0 %611  ;;  %1268 = vmatmul.msk.f32.gmra.mxu2 %vm889_vm6, %v872_v52 }
 0x140   : > { %698 = vst.msk [vmem:[#allocation2 + $0x50] sm:$0xff] %vm687_vm4, %v612_v27  ;;  %v877_v23 = vld [vmem:[#allocation2 + $0xd0] sm:$0xff] }
 0x141   : > { %829 = vst.msk [vmem:[#allocation2 + $0x50] sm:$0xff] %vm818_vm5, %v743_v24  ;;  %1273 = vmatmul.msk.f32.gmra.mxu3 %vm889_vm6, %v877_v23  ;;  %v648_v29 = vpop.permute.xlu2 %647  ;;  %v857_v49 = vld [vmem:[#allocation2 + $0x30] sm:$0xff] }
 0x142   : > { %716 = vst.msk [vmem:[#allocation2 + $0xe0] sm:$0xff] %vm687_vm4, %v648_v29 }
 0x146   : > { %v646_v36 = vpop.permute.xlu1 %645  ;;  %v856_v51 = vld [vmem:[#allocation2 + $0x28] sm:$0xff] }
 0x147   : > { %715 = vst.msk [vmem:[#allocation2 + $0xd8] sm:$0xff] %vm687_vm4, %v646_v36  ;;  %v636_v37 = vpop.permute.xlu0 %635  ;;  %1252 = vmatmul.msk.f32.gmra.mxu0 %vm889_vm6, %v856_v51 }
 0x148   : > { %710 = vst.msk [vmem:[#allocation2 + $0xb0] sm:$0xff] %vm687_vm4, %v636_v37  ;;  %v861_v10 = vld [vmem:[#allocation2 + $0x50] sm:$0xff] }
 0x149   : > { %841 = vst.msk [vmem:[#allocation2 + $0xb0] sm:$0xff] %vm818_vm5, %v767_v28  ;;  %1257 = vmatmul.msk.f32.gmra.mxu1 %vm889_vm6, %v861_v10  ;;  %v606_v22 = vpop.permute.xlu2 %605 }
 0x14a   : > { %695 = vst.msk [vmem:[#allocation2 + $0x38] sm:$0xff] %vm687_vm4, %v606_v22 }
 0x14e   : > { %v614_v63 = vpop.permute.xlu1 %613 }
 0x14f   : > { %699 = vst.msk [vmem:[#allocation2 + $0x58] sm:$0xff] %vm687_vm4, %v614_v63  ;;  %v777_v40 = vpop.permute.xlu0 %776  ;;  %1253 = vmatmul.msk.f32.gmra.mxu0 %vm889_vm6, %v857_v49 }
 0x150   : > { %846 = vst.msk [vmem:[#allocation2 + $0xd8] sm:$0xff] %vm818_vm5, %v777_v40  ;;  %v873_v32 = vld [vmem:[#allocation2 + $0xb0] sm:$0xff] }
 0x151   : > { %1269 = vmatmul.msk.f32.gmra.mxu2 %vm889_vm6, %v873_v32  ;;  %v747_v1 = vpop.permute.xlu2 %746 }
 0x156   : > { %v638_v12 = vpop.permute.xlu1 %637 }
 0x157   : > { %711 = vst.msk [vmem:[#allocation2 + $0xb8] sm:$0xff] %vm687_vm4, %v638_v12  ;;  %v745_v39 = vpop.permute.xlu0 %744  ;;  %v878_v17 = vld [vmem:[#allocation2 + $0xd8] sm:$0xff] }
 0x158   : > { %830 = vst.msk [vmem:[#allocation2 + $0x58] sm:$0xff] %vm818_vm5, %v745_v39  ;;  %1274 = vmatmul.msk.f32.gmra.mxu3 %vm889_vm6, %v878_v17 }
 0x159   : > { %v618_v48 = vpop.permute.xlu2 %617 }
 0x15a   : > { %701 = vst.msk [vmem:[#allocation2 + $0x68] sm:$0xff] %vm687_vm4, %v618_v48 }
 0x15e   : > { %v779_v2 = vpop.permute.xlu1 %778 }
 0x15f   : > { %847 = vst.msk [vmem:[#allocation2 + $0xe0] sm:$0xff] %vm818_vm5, %v779_v2  ;;  %v769_v5 = vpop.permute.xlu0 %768  ;;  %v862_v38 = vld [vmem:[#allocation2 + $0x58] sm:$0xff] }
 0x160   : > { %842 = vst.msk [vmem:[#allocation2 + $0xb8] sm:$0xff] %vm818_vm5, %v769_v5  ;;  %1258 = vmatmul.msk.f32.gmra.mxu1 %vm889_vm6, %v862_v38 }
 0x161   : > { %v783_v53 = vpop.permute.xlu2 %782 }
 0x166   : > { %v737_v25 = vpop.permute.xlu1 %736  ;;  %v879_v3 = vld [vmem:[#allocation2 + $0xe0] sm:$0xff] }
 0x167   : > { %826 = vst.msk [vmem:[#allocation2 + $0x38] sm:$0xff] %vm818_vm5, %v737_v25  ;;  %v874_v41 = vld [vmem:[#allocation2 + $0xb8] sm:$0xff]  ;;  %1275 = vmatmul.msk.f32.gmra.mxu3 %vm889_vm6, %v879_v3  ;;  %v616_v50 = vpop.permute.xlu0 %615  ;;  %v1003_v42 = vpop.f32.mrf.mxu0 }
 0x168   : > { %1270 = vmatmul.msk.f32.gmra.mxu2 %vm889_vm6, %v874_v41  ;;  %700 = vst.msk [vmem:[#allocation2 + $0x60] sm:$0xff] %vm687_vm4, %v616_v50  ;;  %v1004_v8 = vadd.f32 %v2093_v6, %v1003_v42 }
 0x169   : > { %831 = vst.msk [vmem:[#allocation2 + $0x60] sm:$0xff] %vm818_vm5, %v747_v1  ;;  %v654_v60 = vpop.permute.xlu2 %653 }
 0x16a   : > { %1099 = vxpose.xlu0.b32.start [1/16] (narrow) %v1004_v8, 8  ;;  %719 = vst.msk [vmem:[#allocation2 + $0xf8] sm:$0xff] %vm687_vm4, %v654_v60 }
 0x16e   : > { %v858_v34 = vld [vmem:[#allocation2 + $0x38] sm:$0xff]  ;;  %v781_v54 = vpop.permute.xlu1 %780 }
 0x16f   : > { %1254 = vmatmul.msk.f32.gmra.mxu0 %vm889_vm6, %v858_v34  ;;  %v650_v56 = vpop.permute.xlu0 %649  ;;  %v1006_v15 = vpop.f32.mrf.mxu0 }
 0x170   : > { %717 = vst.msk [vmem:[#allocation2 + $0xe8] sm:$0xff] %vm687_vm4, %v650_v56  ;;  %v863_v35 = vld [vmem:[#allocation2 + $0x60] sm:$0xff]  ;;  %v1007_v18 = vadd.f32 %v2093_v6, %v1006_v15 }
 0x171   : > { %848 = vst.msk [vmem:[#allocation2 + $0xe8] sm:$0xff] %vm818_vm5, %v781_v54  ;;  %1259 = vmatmul.msk.f32.gmra.mxu1 %vm889_vm6, %v863_v35  ;;  %v753_v43 = vpop.permute.xlu2 %752 }
 0x172   : > { %1100 = vxpose.xlu0.b32.cont [2/16] (narrow) %v1007_v18, 8 }
 0x176   : > { %v652_v58 = vpop.permute.xlu1 %651 }
 0x177   : > { %v749_v57 = vpop.permute.xlu0 %748  ;;  %718 = vst.msk [vmem:[#allocation2 + $0xf0] sm:$0xff] %vm687_vm4, %v652_v58  ;;  %v1009_v47 = vpop.f32.mrf.mxu0 }
 0x178   : > { %832 = vst.msk [vmem:[#allocation2 + $0x68] sm:$0xff] %vm818_vm5, %v749_v57  ;;  %v880_v13 = vld [vmem:[#allocation2 + $0xe8] sm:$0xff]  ;;  %v1010_v61 = vadd.f32 %v2093_v6, %v1009_v47 }
 0x179   : > { %849 = vst.msk [vmem:[#allocation2 + $0xf0] sm:$0xff] %vm818_vm5, %v783_v53  ;;  %1276 = vmatmul.msk.f32.gmra.mxu3 %vm889_vm6, %v880_v13 }
 0x17a   : > { %1101 = vxpose.xlu0.b32.cont [3/16] (narrow) %v1010_v61, 8 }
 0x17e   : > { %v751_v31 = vpop.permute.xlu1 %750 }
 0x17f   : > { %v620_v46 = vpop.permute.xlu0 %619  ;;  %v864_v33 = vld [vmem:[#allocation2 + $0x68] sm:$0xff] }
 0x180   : > { %702 = vst.msk [vmem:[#allocation2 + $0x70] sm:$0xff] %vm687_vm4, %v620_v46  ;;  %1260 = vmatmul.msk.f32.gmra.mxu1 %vm889_vm6, %v864_v33  ;;  %v881_v20 = vld [vmem:[#allocation2 + $0xf0] sm:$0xff] }
 0x181   : > { %833 = vst.msk [vmem:[#allocation2 + $0x70] sm:$0xff] %vm818_vm5, %v751_v31  ;;  %1277 = vmatmul.msk.f32.gmra.mxu3 %vm889_vm6, %v881_v20 }
 0x183   : > { %v1051_v62 = vpop.f32.mrf.mxu2 }
 0x184   : > { %v1052_v4 = vadd.f32 %v2093_v6, %v1051_v62 }
 0x186   : > { %1131 = vxpose.xlu1.b32.start [1/16] (narrow) %v1052_v4, 8  ;;  %v622_v9 = vpop.permute.xlu1 %621 }
 0x187   : > { %v785_v19 = vpop.permute.xlu0 %784  ;;  %703 = vst.msk [vmem:[#allocation2 + $0x78] sm:$0xff] %vm687_vm4, %v622_v9  ;;  %v1012_v55 = vpop.f32.mrf.mxu0 }
 0x188   : > { %850 = vst.msk [vmem:[#allocation2 + $0xf8] sm:$0xff] %vm818_vm5, %v785_v19  ;;  %v865_v21 = vld [vmem:[#allocation2 + $0x70] sm:$0xff]  ;;  %v1013_v24 = vadd.f32 %v2093_v6, %v1012_v55 }
 0x189   : > { %834 = vst.msk [vmem:[#allocation2 + $0x78] sm:$0xff] %vm818_vm5, %v753_v43  ;;  %1261 = vmatmul.msk.f32.gmra.mxu1 %vm889_vm6, %v865_v21 }
 0x18a   : > { %1102 = vxpose.xlu0.b32.cont [4/16] (narrow) %v1013_v24, 8 }
 0x18c   : > { %v1054_v45 = vpop.f32.mrf.mxu2 }
 0x18d   : > { %v1055_v44 = vadd.f32 %v2093_v6, %v1054_v45 }
 0x18f   : > { %1132 = vxpose.xlu1.b32.cont [2/16] (narrow) %v1055_v44, 8  ;;  %v882_v7 = vld [vmem:[#allocation2 + $0xf8] sm:$0xff] }
 0x190   : > { %1278 = vmatmul.msk.f32.gmra.mxu3 %vm889_vm6, %v882_v7  ;;  %v866_v26 = vld [vmem:[#allocation2 + $0x78] sm:$0xff] }
 0x191   : > { %1262 = vmatmul.msk.f32.gmra.mxu1 %vm889_vm6, %v866_v26 }
 0x194   : > { %v1057_v28 = vpop.f32.mrf.mxu2 }
 0x195   : > { %v1058_v0 = vadd.f32 %v2093_v6, %v1057_v28 }
 0x197   : > { %1133 = vxpose.xlu1.b32.cont [3/16] (narrow) %v1058_v0, 8 }
 0x19c   : > { %v1060_v30 = vpop.f32.mrf.mxu2 }
 0x19d   : > { %v1061_v11 = vadd.f32 %v2093_v6, %v1060_v30 }
 0x19f   : > { %1134 = vxpose.xlu1.b32.cont [4/16] (narrow) %v1061_v11, 8 }
 0x1a3   : > { %v1075_v32 = vpop.f32.mrf.mxu3 }
 0x1a4   : > { %v1076_v17 = vadd.f32 %v2093_v6, %v1075_v32 }
 0x1a5   : > { %v1027_v39 = vpop.f32.mrf.mxu1 }
 0x1a6   : > { %v1028_v2 = vadd.f32 %v2093_v6, %v1027_v39 }
 0x1b2   : > { %v1078_v5 = vpop.f32.mrf.mxu3 }
 0x1b3   : > { %v1063_v59 = vpop.f32.mrf.mxu2  ;;  %v1079_v1 = vadd.f32 %v2093_v6, %v1078_v5 }
 0x1b4   : > { %v1064_v16 = vadd.f32 %v2093_v6, %v1063_v59  ;;  %v1030_v38 = vpop.f32.mrf.mxu1 }
 0x1b5   : > { %v1015_v14 = vpop.f32.mrf.mxu0  ;;  %v1031_v25 = vadd.f32 %v2093_v6, %v1030_v38 }
 0x1b6   : > { %v1016_v52 = vadd.f32 %v2093_v6, %v1015_v14  ;;  %1135 = vxpose.xlu1.b32.cont [5/16] (narrow) %v1064_v16, 8 }
 0x1b8   : > { %1103 = vxpose.xlu0.b32.cont [5/16] (narrow) %v1016_v52, 8 }
 0x1c2   : > { %v1066_v27 = vpop.f32.mrf.mxu2 }
 0x1c3   : > { %v1067_v23 = vadd.f32 %v2093_v6, %v1066_v27 }
 0x1c4   : > { %v1018_v29 = vpop.f32.mrf.mxu0  ;;  %v1081_v3 = vpop.f32.mrf.mxu3 }
 0x1c5   : > { %v1019_v36 = vadd.f32 %v2093_v6, %v1018_v29  ;;  %1136 = vxpose.xlu1.b32.cont [6/16] (narrow) %v1067_v23, 8  ;;  %v1082_v50 = vadd.f32 %v2093_v6, %v1081_v3 }
 0x1c6   : > { %v1033_v41 = vpop.f32.mrf.mxu1 }
 0x1c7   : > { %1104 = vxpose.xlu0.b32.cont [6/16] (narrow) %v1019_v36, 8  ;;  %v1034_v42 = vadd.f32 %v2093_v6, %v1033_v41 }
 0x1cc   : > { %v1021_v51 = vpop.f32.mrf.mxu0 }
 0x1cd   : > { %v1022_v37 = vadd.f32 %v2093_v6, %v1021_v51 }
 0x1cf   : > { %1105 = vxpose.xlu0.b32.cont [7/16] (narrow) %v1022_v37, 8 }
 0x1d4   : > { %v1069_v10 = vpop.f32.mrf.mxu2 }
 0x1d5   : > { %v1070_v22 = vadd.f32 %v2093_v6, %v1069_v10 }
 0x1d7   : > { %1137 = vxpose.xlu1.b32.cont [7/16] (narrow) %v1070_v22, 8 }
 0x1db   : > { %v1084_v8 = vpop.f32.mrf.mxu3 }
 0x1dc   : > { %v1085_v34 = vadd.f32 %v2093_v6, %v1084_v8 }
 0x1dd   : > { %v1036_v48 = vpop.f32.mrf.mxu1 }
 0x1de   : > { %v1037_v54 = vadd.f32 %v2093_v6, %v1036_v48 }
 0x1ea   : > { %v1087_v56 = vpop.f32.mrf.mxu3 }
 0x1eb   : > { %v1072_v49 = vpop.f32.mrf.mxu2  ;;  %v1088_v15 = vadd.f32 %v2093_v6, %v1087_v56 }
 0x1ec   : > { %v1073_v63 = vadd.f32 %v2093_v6, %v1072_v49  ;;  %v1024_v40 = vpop.f32.mrf.mxu0 }
 0x1ed   : > { %v1025_v12 = vadd.f32 %v2093_v6, %v1024_v40 }
 0x1ee   : > { %1138 = vxpose.xlu1.b32.cont [8/16] (narrow) %v1073_v63, 8  ;;  %v1039_v35 = vpop.f32.mrf.mxu1 }
 0x1ef   : > { %1106 = vxpose.xlu0.b32.cont [8/16] (narrow) %v1025_v12, 8  ;;  %v1040_v18 = vadd.f32 %v2093_v6, %v1039_v35 }
 0x1f6   : > { %1139 = vxpose.xlu1.b32.cont [9/16] (narrow) %v1076_v17, 8 }
 0x1f7   : > { %1107 = vxpose.xlu0.b32.cont [9/16] (narrow) %v1028_v2, 8 }
 0x1fc   : > { %v1090_v53 = vpop.f32.mrf.mxu3 }
 0x1fd   : > { %v1042_v58 = vpop.f32.mrf.mxu1  ;;  %v1091_v57 = vadd.f32 %v2093_v6, %v1090_v53 }
 0x1fe   : > { %1140 = vxpose.xlu1.b32.cont [10/16] (narrow) %v1079_v1, 8  ;;  %v1043_v13 = vadd.f32 %v2093_v6, %v1042_v58 }
 0x1ff   : > { %1108 = vxpose.xlu0.b32.cont [10/16] (narrow) %v1031_v25, 8 }
 0x204   : > { %v1093_v61 = vpop.f32.mrf.mxu3 }
 0x205   : > { %v1094_v60 = vadd.f32 %v2093_v6, %v1093_v61 }
 0x206   : > { %1141 = vxpose.xlu1.b32.cont [11/16] (narrow) %v1082_v50, 8  ;;  %v1045_v47 = vpop.f32.mrf.mxu1 }
 0x207   : > { %1109 = vxpose.xlu0.b32.cont [11/16] (narrow) %v1034_v42, 8  ;;  %v1046_v31 = vadd.f32 %v2093_v6, %v1045_v47 }
 0x20e   : > { %1142 = vxpose.xlu1.b32.cont [12/16] (narrow) %v1085_v34, 8  ;;  %v1048_v33 = vpop.f32.mrf.mxu1 }
 0x20f   : > { %1110 = vxpose.xlu0.b32.cont [12/16] (narrow) %v1037_v54, 8  ;;  %v1049_v62 = vadd.f32 %v2093_v6, %v1048_v33 }
 0x213   : > { %v1096_v46 = vpop.f32.mrf.mxu3 }
 0x214   : > { %v1097_v20 = vadd.f32 %v2093_v6, %v1096_v46 }
 0x216   : > { %1143 = vxpose.xlu1.b32.cont [13/16] (narrow) %v1088_v15, 8 }
 0x217   : > { %1111 = vxpose.xlu0.b32.cont [13/16] (narrow) %v1040_v18, 8 }
 0x21e   : > { %1144 = vxpose.xlu1.b32.cont [14/16] (narrow) %v1091_v57, 8 }
 0x21f   : > { %1112 = vxpose.xlu0.b32.cont [14/16] (narrow) %v1043_v13, 8 }
 0x226   : > { %1145 = vxpose.xlu1.b32.cont [15/16] (narrow) %v1094_v60, 8 }
 0x227   : > { %1113 = vxpose.xlu0.b32.cont [15/16] (narrow) %v1046_v31, 8 }
 0x22e   : > { %1146 = vxpose.xlu1.b32.end [16/16] (narrow) %v1097_v20, 8 }
 0x22f   : > { %1114 = vxpose.xlu0.b32.end [16/16] (narrow) %v1049_v62, 8 }
 0x25a   : > { %v1147_v4 = vpop.trf.xlu1 }
 0x25b   : > { %1164 = vst [vmem:[%s163_s26 + $0x8] sm:$0xff] %v1147_v4  ;;  %v1115_v9 = vpop.trf.xlu0 }
 0x25c   : > { %1163 = vst [vmem:[%s163_s26] sm:$0xff] %v1115_v9 }
 0x25d   : > { %1362 = shalt.err (!%p1359_p3)
}
 0x25e   : > { %1292 = dma.vmem_to_hbm [thread:$0]  (%p1460_p5), %s1180_s27, 256, %s1182_s28, %s1166_s29  }
 0x25f PF: > { %p1298_p4 = scmp.ge.s32.totalorder %s1397_s15, 2  ;;  %s1193_s9 = sand.u32 1, %s1385_s12  }
 0x260   : > { %s1194_s10 = scalar_lea.sflag [#allocation4], %s1193_s9 }
 0x261   : > { %p1295_p7 = pnand %p1298_p4, %p1464_p6 }
 0x263   : > { %p1296_p8 = pneg %p1295_p7 }
 0x265   : > { %1380 = dma.done.wait (%p1296_p8), %s1194_s10, 256  }
 0x266   : > { %1382 = vsyncadd (%p1296_p8), %s1194_s10, 4294967040  ;;  %p13_p9 = scmp.ge.s32.totalorder %s1447_s18, 4   ;;  %s2190_s12 = smov %s1389_s13 }
 0x267   : > { %s2191_s13 = smov %s1393_s14  ;;  %s2192_s14 = smov %s1458_s21 }
 0x268   : > { %s2193_s15 = smov %s1447_s18  ;;  %15 = sbr.rel (!%p13_p9) target bundleno = 3 (0x3), region = 67 }
 0x26d   :  { %1200 = vsyncpa [#allocation4], 1 }
 0x26e   :  { %1202 = vsyncpa [#allocation4 + $0x1], 1 }

</bundles_post_ra>
